<compile_context>
chip_gen: v6e
topology: v6e:2x2x1
jax: 0.10.0
libtpu: 0.0.40
codegen_flags: <defaults>
</compile_context>

<pallas_src>
import functools

import jax
import jax.numpy as jnp
from jax.experimental import pallas as pl
from jax.experimental.pallas import tpu as pltpu


def _round_up(n, m):
    return ((n + m - 1) // m) * m


def _dqn_mlp_kernel(x_ref, w1_ref, b1_ref, w2_ref, b2_ref, w3_ref, b3_ref, o_ref):
    # Fused 3-layer MLP on one (TM, obs) batch tile.
    # bf16 operands feed the MXU; accumulation / bias / ReLU stay f32.
    x = x_ref[...].astype(jnp.bfloat16)                                 # in-kernel cast (VPU)
    h1 = jnp.dot(x, w1_ref[...], preferred_element_type=jnp.float32) + b1_ref[...]
    h1 = jnp.maximum(h1, 0.0).astype(jnp.bfloat16)
    h2 = jnp.dot(h1, w2_ref[...], preferred_element_type=jnp.float32) + b2_ref[...]
    h2 = jnp.maximum(h2, 0.0).astype(jnp.bfloat16)
    q = jnp.dot(h2, w3_ref[...], preferred_element_type=jnp.float32) + b3_ref[...]
    o_ref[...] = q.astype(o_ref.dtype)                                  # narrow (TM, n_actions)


def _resident(shape):
    # Same block index at every grid step -> weights DMA'd into VMEM once,
    # kept resident across the batch grid (no per-step re-DMA).
    return pl.BlockSpec(shape, lambda i: (0,) * len(shape))


@functools.partial(jax.jit, static_argnames=("tile_m",))
def dqn_forward_pallas(x, w1, b1, w2, b2, w3, b3, *, tile_m=1024):
    """x: (batch, obs) f32.  Weights bf16 (in, out); biases f32 (1, out).
    Output is (batch, n_actions) f32 -- no lane padding in HBM."""
    batch, obs_dim = x.shape
    n_actions = w3.shape[1]

    # One block for small batches (grid=1, no pipeline overhead); otherwise
    # large tiles so the grid has only a few "parallel" steps (v7x megacore).
    tm = tile_m if batch > tile_m else max(8, _round_up(batch, 8))
    padded_batch = _round_up(batch, tm)
    if padded_batch != batch:
        x = jnp.pad(x, ((0, padded_batch - batch), (0, 0)))

    out = pl.pallas_call(
        _dqn_mlp_kernel,
        out_shape=jax.ShapeDtypeStruct((padded_batch, n_actions), jnp.float32),
        grid=(padded_batch // tm,),
        in_specs=[
            pl.BlockSpec((tm, obs_dim), lambda i: (i, 0)),   # batch-tiled activations
            _resident(w1.shape), _resident(b1.shape),
            _resident(w2.shape), _resident(b2.shape),
            _resident(w3.shape), _resident(b3.shape),
        ],
        out_specs=pl.BlockSpec((tm, n_actions), lambda i: (i, 0)),
        compiler_params=pltpu.CompilerParams(
            # Batch tiles are independent -> megacore sharding (2x on v7x).
            dimension_semantics=("parallel",),
        ),
    )(x, w1, b1, w2, b2, w3, b3)
    if padded_batch != batch:
        out = out[:batch]
    return out


class DQNWrapperPallas:
    """JAX/Pallas equivalent of DQNWrapper(nn=DQN-MLP, state_converter=default)."""

    @staticmethod
    def _def_converter(state):
        return (state,)

    def __init__(self, params, state_converter=None, tile_m=1024):
        w1, b1, w2, b2, w3, b3 = params
        # Pre-cast weights to bf16 (MXU-native) once at construction; biases
        # stay f32 for the f32 epilogue.  No output-lane padding anymore.
        self._params = (
            w1.astype(jnp.bfloat16), b1.astype(jnp.float32),
            w2.astype(jnp.bfloat16), b2.astype(jnp.float32),
            w3.astype(jnp.bfloat16), b3.astype(jnp.float32),
        )
        self._tile_m = int(tile_m)
        self._converter = state_converter or self._def_converter

    def forward(self, x):
        args = self._converter(x)        # state -> tuple (wrapper semantics)
        (x,) = args
        return dqn_forward_pallas(x, *self._params, tile_m=self._tile_m)


def init_params(key, obs_dim, hidden, n_actions):
    # Deterministic synthetic parameters (PyTorch-Linear-like uniform init),
    # stored (in_features, out_features) so the kernel computes x @ W + b.
    ks = jax.random.split(key, 6)

    def lin(kw, kb, fan_in, fan_out):
        bound = 1.0 / jnp.sqrt(fan_in)
        w = jax.random.uniform(kw, (fan_in, fan_out), jnp.float32, -bound, bound)
        b = jax.random.uniform(kb, (1, fan_out), jnp.float32, -bound, bound)
        return w, b

    w1, b1 = lin(ks[0], ks[1], obs_dim, hidden)
    w2, b2 = lin(ks[2], ks[3], hidden, hidden)
    w3, b3 = lin(ks[4], ks[5], hidden, n_actions)
    return (w1, b1, w2, b2, w3, b3)


if __name__ == "__main__":
    key = jax.random.PRNGKey(0)
    k_x, k_p = jax.random.split(key)

    batch, obs_dim, hidden, n_actions = 8, 16, 32, 4
    x = jax.random.normal(k_x, (batch, obs_dim), jnp.float32)
    params = init_params(k_p, obs_dim, hidden, n_actions)

    model = DQNWrapperPallas(params)
    q = model.forward(x)
    jax.block_until_ready(q)

    # Pure-JAX reference mirroring the kernel's bf16-operand / f32-accumulate path.
    # TODO(synk): if strict f32 parity with a PyTorch f32 DQN is required, keep the
    # first-layer matmul in f32 (it is tiny) instead of bf16 operands.
    w1, b1, w2, b2, w3, b3 = params

    def bf(a):
        return a.astype(jnp.bfloat16).astype(jnp.float32)

    h = jnp.maximum(bf(x) @ bf(w1) + b1, 0.0)
    h = jnp.maximum(bf(h) @ bf(w2) + b2, 0.0)
    ref = bf(h) @ bf(w3) + b3

    assert q.shape == (batch, n_actions)
    assert jnp.allclose(q, ref, atol=5e-3, rtol=5e-3), float(jnp.max(jnp.abs(q - ref)))

    print("KERNEL_OK")
</pallas_src>

<mosaic_0001>
module attributes {stable_mosaic.version = 11 : i64} {
  func.func @_dqn_mlp_kernel(%arg0: i32, %arg1: memref<8x16xf32, #tpu.memory_space<vmem>>, %arg2: memref<16x32xbf16, #tpu.memory_space<vmem>>, %arg3: memref<1x32xf32, #tpu.memory_space<vmem>>, %arg4: memref<32x32xbf16, #tpu.memory_space<vmem>>, %arg5: memref<1x32xf32, #tpu.memory_space<vmem>>, %arg6: memref<32x4xbf16, #tpu.memory_space<vmem>>, %arg7: memref<1x4xf32, #tpu.memory_space<vmem>>, %arg8: memref<8x4xf32, #tpu.memory_space<vmem>>) attributes {dimension_semantics = [#tpu.dimension_semantics<parallel>], iteration_bounds = array<i64: 1>, scalar_prefetch = 0 : i64, scratch_operands = 0 : i64, tpu.core_type = #tpu.core_type<tc>, window_params = [{transform_indices = @transform_0, window_bounds = array<i64: 8, 16>}, {pipeline_mode = #tpu.pipeline_mode<synchronous>, transform_indices = @transform_1, window_bounds = array<i64: 16, 32>}, {pipeline_mode = #tpu.pipeline_mode<synchronous>, transform_indices = @transform_2, window_bounds = array<i64: 1, 32>}, {pipeline_mode = #tpu.pipeline_mode<synchronous>, transform_indices = @transform_3, window_bounds = array<i64: 32, 32>}, {pipeline_mode = #tpu.pipeline_mode<synchronous>, transform_indices = @transform_4, window_bounds = array<i64: 1, 32>}, {pipeline_mode = #tpu.pipeline_mode<synchronous>, transform_indices = @transform_5, window_bounds = array<i64: 32, 4>}, {pipeline_mode = #tpu.pipeline_mode<synchronous>, transform_indices = @transform_6, window_bounds = array<i64: 1, 4>}, {transform_indices = @transform_7, window_bounds = array<i64: 8, 4>}]} {
    %c0 = arith.constant 0 : index
    %c0_0 = arith.constant 0 : index
    %0 = vector.load %arg1[%c0, %c0_0] : memref<8x16xf32, #tpu.memory_space<vmem>>, vector<8x16xf32>
    %1 = arith.truncf %0 : vector<8x16xf32> to vector<8x16xbf16>
    %c0_1 = arith.constant 0 : index
    %c0_2 = arith.constant 0 : index
    %2 = vector.load %arg2[%c0_1, %c0_2] : memref<16x32xbf16, #tpu.memory_space<vmem>>, vector<16x32xbf16>
    %cst = arith.constant dense<0.000000e+00> : vector<8x32xf32>
    %3 = tpu.matmul %1, %2, %cst {dimension_numbers = #tpu.dot_dimension_numbers<[1], [0], [0], [1], [0, 0, 1, 1], [], []>} : vector<8x16xbf16>, vector<16x32xbf16>, vector<8x32xf32> -> vector<8x32xf32>
    %c0_3 = arith.constant 0 : index
    %c0_4 = arith.constant 0 : index
    %4 = vector.load %arg3[%c0_3, %c0_4] : memref<1x32xf32, #tpu.memory_space<vmem>>, vector<1x32xf32>
    %5 = vector.broadcast %4 : vector<1x32xf32> to vector<8x32xf32>
    %6 = arith.addf %3, %5 : vector<8x32xf32>
    %cst_5 = arith.constant 0.000000e+00 : f32
    %7 = vector.broadcast %cst_5 : f32 to vector<8x32xf32>
    %8 = arith.maximumf %6, %7 : vector<8x32xf32>
    %9 = arith.truncf %8 : vector<8x32xf32> to vector<8x32xbf16>
    %c0_6 = arith.constant 0 : index
    %c0_7 = arith.constant 0 : index
    %10 = vector.load %arg4[%c0_6, %c0_7] : memref<32x32xbf16, #tpu.memory_space<vmem>>, vector<32x32xbf16>
    %cst_8 = arith.constant dense<0.000000e+00> : vector<8x32xf32>
    %11 = tpu.matmul %9, %10, %cst_8 {dimension_numbers = #tpu.dot_dimension_numbers<[1], [0], [0], [1], [0, 0, 1, 1], [], []>} : vector<8x32xbf16>, vector<32x32xbf16>, vector<8x32xf32> -> vector<8x32xf32>
    %c0_9 = arith.constant 0 : index
    %c0_10 = arith.constant 0 : index
    %12 = vector.load %arg5[%c0_9, %c0_10] : memref<1x32xf32, #tpu.memory_space<vmem>>, vector<1x32xf32>
    %13 = vector.broadcast %12 : vector<1x32xf32> to vector<8x32xf32>
    %14 = arith.addf %11, %13 : vector<8x32xf32>
    %cst_11 = arith.constant 0.000000e+00 : f32
    %15 = vector.broadcast %cst_11 : f32 to vector<8x32xf32>
    %16 = arith.maximumf %14, %15 : vector<8x32xf32>
    %17 = arith.truncf %16 : vector<8x32xf32> to vector<8x32xbf16>
    %c0_12 = arith.constant 0 : index
    %c0_13 = arith.constant 0 : index
    %18 = vector.load %arg6[%c0_12, %c0_13] : memref<32x4xbf16, #tpu.memory_space<vmem>>, vector<32x4xbf16>
    %cst_14 = arith.constant dense<0.000000e+00> : vector<8x4xf32>
    %19 = tpu.matmul %17, %18, %cst_14 {dimension_numbers = #tpu.dot_dimension_numbers<[1], [0], [0], [1], [0, 0, 1, 1], [], []>} : vector<8x32xbf16>, vector<32x4xbf16>, vector<8x4xf32> -> vector<8x4xf32>
    %c0_15 = arith.constant 0 : index
    %c0_16 = arith.constant 0 : index
    %20 = vector.load %arg7[%c0_15, %c0_16] : memref<1x4xf32, #tpu.memory_space<vmem>>, vector<1x4xf32>
    %21 = vector.broadcast %20 : vector<1x4xf32> to vector<8x4xf32>
    %22 = arith.addf %19, %21 : vector<8x4xf32>
    %c0_17 = arith.constant 0 : index
    %c0_18 = arith.constant 0 : index
    %23 = vector.load %arg8[%c0_17, %c0_18] : memref<8x4xf32, #tpu.memory_space<vmem>>, vector<8x4xf32>
    tpu.vector_store %arg8[%c0_17, %c0_18], %22 {strides = array<i32>} : memref<8x4xf32, #tpu.memory_space<vmem>>, vector<8x4xf32>,
    return
  }
  func.func @transform_0(%arg0: i32) -> (i32, i32) {
    %c0_i32 = arith.constant 0 : i32
    %c0_i32_0 = arith.constant 0 : i32
    return %arg0, %c0_i32 : i32, i32
  }
  func.func @transform_1(%arg0: i32) -> (i32, i32) {
    %c0_i32 = arith.constant 0 : i32
    %c0_i32_0 = arith.constant 0 : i32
    %c0_i32_1 = arith.constant 0 : i32
    return %c0_i32, %c0_i32_0 : i32, i32
  }
  func.func @transform_2(%arg0: i32) -> (i32, i32) {
    %c0_i32 = arith.constant 0 : i32
    %c0_i32_0 = arith.constant 0 : i32
    %c0_i32_1 = arith.constant 0 : i32
    return %c0_i32, %c0_i32_0 : i32, i32
  }
  func.func @transform_3(%arg0: i32) -> (i32, i32) {
    %c0_i32 = arith.constant 0 : i32
    %c0_i32_0 = arith.constant 0 : i32
    %c0_i32_1 = arith.constant 0 : i32
    return %c0_i32, %c0_i32_0 : i32, i32
  }
  func.func @transform_4(%arg0: i32) -> (i32, i32) {
    %c0_i32 = arith.constant 0 : i32
    %c0_i32_0 = arith.constant 0 : i32
    %c0_i32_1 = arith.constant 0 : i32
    return %c0_i32, %c0_i32_0 : i32, i32
  }
  func.func @transform_5(%arg0: i32) -> (i32, i32) {
    %c0_i32 = arith.constant 0 : i32
    %c0_i32_0 = arith.constant 0 : i32
    %c0_i32_1 = arith.constant 0 : i32
    return %c0_i32, %c0_i32_0 : i32, i32
  }
  func.func @transform_6(%arg0: i32) -> (i32, i32) {
    %c0_i32 = arith.constant 0 : i32
    %c0_i32_0 = arith.constant 0 : i32
    %c0_i32_1 = arith.constant 0 : i32
    return %c0_i32, %c0_i32_0 : i32, i32
  }
  func.func @transform_7(%arg0: i32) -> (i32, i32) {
    %c0_i32 = arith.constant 0 : i32
    %c0_i32_0 = arith.constant 0 : i32
    return %arg0, %c0_i32 : i32, i32
  }
}

</mosaic_0001>

<bundles_post_ra>
// kernel: dqn_forward_pallas.1
= control target key start
LH: loop header
LB: loop body
LE: loop exit
PB: predicated region body
PF: predicated region fallthrough
CT: control target
= control target key end

     0   :  { %12 = vsyncpa [#allocation3], 0  ;;  %s431_s0 = inlined_call_operand.hbm [shape: f32[8,16], index: 0, kind: input, shape index: {}]   ;;  %s432_s1 = inlined_call_operand.hbm [shape: bf16[16,32], index: 1, kind: input, shape index: {}]   ;;  %s433_s2 = inlined_call_operand.vmem [shape: f32[1,32], index: 2, kind: input, shape index: {}]   ;;  %s434_s3 = inlined_call_operand.vmem [shape: bf16[32,32], index: 3, kind: input, shape index: {}]   ;;  %s435_s4 = inlined_call_operand.vmem [shape: f32[1,32], index: 4, kind: input, shape index: {}]   ;;  %s436_s5 = inlined_call_operand.vmem [shape: bf16[32,4], index: 5, kind: input, shape index: {}]   ;;  %s437_s6 = inlined_call_operand.vmem [shape: f32[1,4], index: 6, kind: input, shape index: {}]   ;;  %s438_s7 = inlined_call_operand.vmem [shape: f32[8,4], index: 7, kind: output, shape index: {}]  }
   0x1   :  { %13 = vsyncpa [#allocation5], 0  ;;  %s355_s24 = smov [#allocation2]   ;;  %s356_s26 = smov [#allocation4]  }
   0x2   :  { %s20_s25 = sshll.u32 %s355_s24, 4  ;;  %s29_s27 = sshll.u32 %s356_s26, 4  ;;  %s21_s25 = int_to_ptr.vmem [resolvable:$true] %s20_s25  ;;  %s30_s27 = int_to_ptr.vmem [resolvable:$true] %s29_s27 }
   0x3   :  { %s319_s28 = scalar_lea.vmem %s21_s25, 128  ;;  %p324_p1 = scmp.lt.s32.totalorder %s21_s25, %s21_s25 }
   0x4   :  { %p320_p0 = scmp.ne.s32.totalorder %s21_s25, %s319_s28  ;;  %p325_p2 = scmp.lt.s32.totalorder %s319_s28, %s319_s28 }
   0x6   :  { %p326_p3 = por %p325_p2, %p324_p1 }
   0x8   :  { %p327_p4 = pnand %p326_p3, %p320_p0 }
   0xa   :  { %330 = shalt.err (!%p327_p4)
}
   0xb   :  { %23 = dma.hbm_to_vmem [thread:$0]  %s431_s0, 128, %s21_s25, [#allocation3]  }
   0xc   :  { %s339_s8 = scalar_lea.vmem %s30_s27, 128  ;;  %p344_p6 = scmp.lt.s32.totalorder %s30_s27, %s30_s27 }
   0xd   :  { %p340_p5 = scmp.ne.s32.totalorder %s30_s27, %s339_s8  ;;  %p345_p7 = scmp.lt.s32.totalorder %s339_s8, %s339_s8 }
   0xf   :  { %p346_p8 = por %p345_p7, %p344_p6 }
  0x11   :  { %p347_p9 = pnand %p346_p8, %p340_p5 }
  0x13   :  { %350 = shalt.err (!%p347_p9)
}
  0x14   :  { %s357_s9 = smov 64   ;;  %s358_s10 = smov 4  }
  0x15   :  { %35 = dma.hbm_to_vmem [thread:$0]  %s432_s1, 128, %s30_s27, [#allocation5], %s357_s9, %s357_s9, %s358_s10  }
  0x16   :  { %351 = dma.done.wait [#allocation3], 128  }
  0x17   :  { %352 = vsyncadd [#allocation3], 4294967168 }
  0x18   :  { %353 = dma.done.wait [#allocation5], 128  }
  0x19   :  { %354 = vsyncadd [#allocation5], 4294967168  ;;  %v359_v0 = vmov 0.0   ;;  %vm360_vm0 = vmmov 0   ;;  %v306_v1 = vld [vmem:[#allocation4] sm:$0xff]   ;;  %v53_v2 = vld [vmem:[#allocation2] sm:$0xff] }
  0x1a   :  { %278 = vmatprep.subr.bf16.mxu0 %v359_v0  ;;  %280 = vmatprep.mubr.msk.bf16.mxu0 %vm360_vm0, %v359_v0  ;;  %vm70_vm1 = vcmask 130048   ;;  %v54_v3 = vpack.c.bf16 %v53_v2, %v53_v2  ;;  %v307_v4 = vld [vmem:[%s434_s3 + $0x8] sm:$0xff]   ;;  %v308_v5 = vld [vmem:[%s434_s3] sm:$0xff]   ;;  %vm139_vm2 = vcmask 261120   ;;  %vm251_vm3 = vcmask 31744  }
  0x1b   :  { %284 = vmatprep.subr.bf16.mxu1 %v359_v0  ;;  %288 = vmatprep.mubr.msk.bf16.mxu1 %vm360_vm0, %v359_v0  ;;  %v309_v6 = vld [vmem:[%s436_s5 + $0x8] sm:$0xff]   ;;  %v259_v7 = vld [vmem:[%s433_s2] ss:$0 sm:$0xff] }
  0x1c   :  { %279 = vmatpush3.bf16.msra.mxu0 %v306_v1  ;;  %285 = vmatpush3.bf16.msra.mxu1 %v307_v4  ;;  %v310_v15 = vld [vmem:[%s436_s5] sm:$0xff]  }
  0x1d   :  { %292 = vmatprep.subr.bf16.mxu0 %v359_v0  ;;  %286 = vmatprep.subr.bf16.mxu1 %v359_v0  ;;  %v262_v16 = vld [vmem:[%s435_s4] ss:$0 sm:$0xff] }
  0x1e   :  { %v266_v24 = vld [vmem:[%s437_s6] ss:$0 sm:$0xff] }
  0x1f   :  { %281 = vmatmul.mubr.msk.bf16.vlgmr.msra.gmra.mxu0 %vm70_vm1, %v54_v3 }
  0x20   :  { %296 = vmatprep.mubr.msk.bf16.mxu0 %vm360_vm0, %v359_v0  ;;  %287 = vmatpush3.bf16.msra.mxu1 %v308_v5 }
  0x21   :  { %293 = vmatpush3.bf16.msra.mxu0 %v309_v6 }
  0x22   :  { %294 = vmatprep.subr.bf16.mxu0 %v359_v0 }
  0x25   :  { %295 = vmatpush3.bf16.msra.mxu0 %v310_v15 }
  0xdf   :  { %v108_v8 = vpop.f32.mrf.mxu0 }
  0xe0   :  { %v109_v9 = vadd.f32 %v259_v7, %v108_v8 }
  0xe1   :  { %v282_v10 = vpop.f32.mrf.mxu0 }
  0xe2   :  { %v114_v11 = vmax.f32 %v109_v9, 0.0 }
  0xe3   :  { %v111_v12 = vpop.f32.mrf.mxu0 }
  0xe4   :  { %v115_v13 = vpack.c.bf16 %v114_v11, %v114_v11 }
  0xe5   :  { %v283_v14 = vpop.f32.mrf.mxu0 }
  0xe6   :  { %289 = vmatmul.mubr.msk.bf16.vlgmr.msra.gmra.mxu1 %vm139_vm2, %v115_v13 }
 0x1a6   :  { %v177_v17 = vpop.f32.mrf.mxu1 }
 0x1a7   :  { %v178_v18 = vadd.f32 %v262_v16, %v177_v17 }
 0x1a8   :  { %v290_v19 = vpop.f32.mrf.mxu1 }
 0x1a9   :  { %v183_v20 = vmax.f32 %v178_v18, 0.0 }
 0x1aa   :  { %v180_v21 = vpop.f32.mrf.mxu1 }
 0x1ab   :  { %v184_v22 = vpack.c.bf16 %v183_v20, %v183_v20 }
 0x1ac   :  { %v291_v23 = vpop.f32.mrf.mxu1 }
 0x1ad   :  { %297 = vmatmul.mubr.msk.bf16.vlgmr.msra.gmra.mxu0 %vm139_vm2, %v184_v22 }
 0x26d   :  { %v245_v25 = vpop.f32.mrf.mxu0 }
 0x26e   :  { %v246_v26 = vadd.f32 %v266_v24, %v245_v25 }
 0x26f   :  { %v298_v27 = vpop.f32.mrf.mxu0 }
 0x270   :  { %252 = vst.msk [vmem:[%s438_s7] sm:$0xff] %vm251_vm3, %v246_v26 }
 0x271   :  { %v248_v28 = vpop.f32.mrf.mxu0 }
 0x273   :  { %v299_v29 = vpop.f32.mrf.mxu0 }
 0x274   :  { %257 = vsyncpa [#allocation3], 1 }
 0x275   :  { %258 = vsyncpa [#allocation5], 1 }

</bundles_post_ra>
